<compile_context>
chip_gen: v7x
topology: tpu7x:2x2x1
jax: 0.10.0
libtpu: 0.0.40
codegen_flags: <defaults>
</compile_context>

<pallas_src>
import jax
import jax.numpy as jnp
import numpy as np
from jax.experimental import pallas as pl
from jax.experimental.pallas import tpu as pltpu


# ----------------------------------------------------------------------------
# Hardware-aware budgeting helpers
# ----------------------------------------------------------------------------
def _vmem_budgets():
    """(vmem_limit_bytes, fused_block_budget_bytes) derived from the chip.

    ~96 / 80 MiB on v5e/v6e (128 MiB physical VMEM), ~48 / 40 MiB on v7x
    (64 MiB physical).  Falls back to conservative v7x numbers if the query
    is unavailable.
    """
    try:
        cap = int(pltpu.get_tpu_info().vmem_capacity_bytes)
    except Exception:
        cap = 64 * 1024 * 1024
    return (cap * 3) // 4, (cap * 5) // 8


def _round_up(n, m):
    return ((n + m - 1) // m) * m


def _sublane(itemsize):
    # Sublane packing tile: f32 -> 8, bf16 -> 16, int8/fp8 -> 32.
    return max(8, 32 // max(1, int(itemsize)))


def _bspec(shape, index_map, single_buffered=False):
    """BlockSpec; constant-index operands get single buffering when supported."""
    if single_buffered:
        try:
            return pl.BlockSpec(shape, index_map, pipeline_mode=pl.Buffered(1))
        except TypeError:  # older jax without pipeline_mode kwarg
            pass
    return pl.BlockSpec(shape, index_map)


# ----------------------------------------------------------------------------
# Kernels
# ----------------------------------------------------------------------------
def _cca_fused_kernel(x_ref, g_ref, w_ref, b_ref, out_ref):
    # Block shapes:
    #   x_ref  : [bt, F_x, HWx]      g_ref : [bt, F_g, HWg]
    #   w_ref  : [F_x + F_g, F_x]    ([Wx^T; Wg^T], model dtype)
    #   b_ref  : [1, F_x]            (bx + bg, f32)
    #   out_ref: [bt, F_x, HWx]
    x = x_ref[...]                                               # native dtype

    # Global average pool over the flattened spatial (lane) axis; accumulate
    # in f32 — results are tiny [bt, F] vectors.
    pooled_x = jnp.mean(x, axis=-1, dtype=jnp.float32)           # [bt, F_x]
    pooled_g = jnp.mean(g_ref[...], axis=-1, dtype=jnp.float32)  # [bt, F_g]
    pooled = jnp.concatenate([pooled_x, pooled_g], axis=-1)      # [bt, F_x+F_g]

    # Single fused linear: (px@Wx^T + bx) + (pg@Wg^T + bg).
    att = jnp.dot(pooled.astype(w_ref.dtype), w_ref[...],
                  preferred_element_type=jnp.float32) + b_ref[...]
    scale = jax.nn.sigmoid(att * 0.5).astype(x.dtype)            # [bt, F_x]

    # Broadcast over spatial, multiply, ReLU — all in the input dtype.
    out = jnp.maximum(x * scale[:, :, None], jnp.zeros((), x.dtype))
    out_ref[...] = out.astype(out_ref.dtype)


def _scale_relu_kernel(x_ref, s_ref, o_ref):
    # x_ref: [tr, thw], s_ref: [tr, 1] (f32), o_ref: [tr, thw]
    x = x_ref[...]
    s = s_ref[...].astype(x.dtype)
    o_ref[...] = jnp.maximum(x * s, jnp.zeros((), x.dtype)).astype(o_ref.dtype)


# ----------------------------------------------------------------------------
# Tiling helpers
# ----------------------------------------------------------------------------
def _pick_batch_tile(batch, per_batch_bytes, budget, target_bytes=4 << 20):
    """Divisor bt of `batch` whose double-buffered blocks fit `budget`.

    Prefers >= 4 grid steps (pipeline depth + v7x two-core balance), an even
    step count, and per-step blocks near `target_bytes` (~4 MiB)."""
    fits = [d for d in range(1, batch + 1)
            if batch % d == 0 and 2 * d * per_batch_bytes <= budget]
    if not fits:
        return 1

    def score(d):
        steps = batch // d
        block = d * per_batch_bytes
        return (0 if steps >= 4 else 1,
                0 if steps % 2 == 0 else 1,
                abs(block - target_bytes))

    return min(fits, key=score)


def _pick_2d_tiles(rows, hw, itemsize, budget, target_bytes=4 << 20):
    """(row_tile, lane_tile) for the 2-D elementwise pass.

    Lane tile is the largest 128-multiple <= hw (capped by the byte target);
    row tile is a sublane multiple sized so the block hits ~target_bytes.
    Ragged boundary blocks are handled by a cdiv grid."""
    sub = _sublane(itemsize)
    rows_padded = _round_up(rows, sub)
    if hw <= 128:
        thw = hw                      # full extent (allowed by BlockSpec rules)
    else:
        thw = hw - (hw % 128)         # largest 128-multiple <= hw
        max_lane = max(128, ((target_bytes // (sub * itemsize)) // 128) * 128)
        thw = min(thw, max_lane)
    tr = max(sub, ((target_bytes // max(1, thw * itemsize)) // sub) * sub)
    tr = min(tr, rows_padded)
    # x block + out block, each double-buffered, must fit the budget.
    while 4 * tr * thw * itemsize > budget and tr > sub:
        tr = max(sub, ((tr // 2) // sub) * sub)
    return tr, thw


# ----------------------------------------------------------------------------
# Two-pass pass-1: pooling + fused linear + sigmoid ([B, F]-sized), jitted so
# XLA fuses it into one read of x and one read of g.
# ----------------------------------------------------------------------------
@jax.jit
def _cca_pass1(x3, g3, w_cat, b_cat):
    pooled_x = jnp.mean(x3, axis=-1, dtype=jnp.float32)          # [B, F_x]
    pooled_g = jnp.mean(g3, axis=-1, dtype=jnp.float32)          # [B, F_g]
    pooled = jnp.concatenate([pooled_x, pooled_g], axis=-1)
    att = jnp.dot(pooled.astype(w_cat.dtype), w_cat,
                  preferred_element_type=jnp.float32) + b_cat
    return jax.nn.sigmoid(att * 0.5)                             # f32 [B, F_x]


# ----------------------------------------------------------------------------
# Wrapper
# ----------------------------------------------------------------------------
def cca_forward(g, x, wx, bx, wg, bg, force_two_pass=False):
    """g: [B, F_g, Hg, Wg], x: [B, F_x, Hx, Wx] (NCHW, like PyTorch)."""
    B, F_x, Hx, Wx = x.shape
    Bg, F_g, Hg, Wg = g.shape
    assert B == Bg
    assert wx.shape == (F_x, F_x) and wg.shape == (F_x, F_g)
    HWx, HWg = Hx * Wx, Hg * Wg

    x3 = x.reshape(B, F_x, HWx)
    g3 = g.reshape(B, F_g, HWg)

    # Fuse the two tiny linears:
    #   (px@Wx^T + bx) + (pg@Wg^T + bg) == [px, pg] @ [[Wx^T],[Wg^T]] + (bx+bg)
    # Weights stay in their model dtype (MXU accumulates in f32); bias in f32.
    w_cat = jnp.concatenate([wx.T, wg.T], axis=0)                # [F_x+F_g, F_x]
    b_cat = (bx.astype(jnp.float32) + bg.astype(jnp.float32)).reshape(1, F_x)

    vmem_limit, fused_budget = _vmem_budgets()

    isz_x = x.dtype.itemsize
    isz_g = g.dtype.itemsize
    isz_w = w_cat.dtype.itemsize
    # Layout-padded per-batch footprint of the fused per-step block
    # (x in + out + g), matching Mosaic's (sublane, 128) allocation granules.
    padded_x = _round_up(F_x, _sublane(isz_x)) * _round_up(HWx, 128) * isz_x
    padded_g = _round_up(F_g, _sublane(isz_g)) * _round_up(HWg, 128) * isz_g
    per_batch_bytes = 2 * padded_x + padded_g
    # Single-buffered constant weight + bias blocks.
    weight_bytes = (_round_up(F_x + F_g, _sublane(isz_w)) * _round_up(F_x, 128) * isz_w
                    + 8 * _round_up(F_x, 128) * 4)

    use_fused = (not force_two_pass
                 and 2 * per_batch_bytes + weight_bytes <= fused_budget)
    bt = 1
    if use_fused:
        bt = _pick_batch_tile(B, per_batch_bytes, fused_budget - weight_bytes)
        steps = B // bt
        # A 1-step fused grid has no DMA/compute overlap and idles one v7x
        # TensorCore; for non-trivial feature maps the tiled two-pass wins.
        if steps < 2 and B * per_batch_bytes > (2 << 20):
            use_fused = False

    if use_fused:
        # ------------------------------------------------------------------
        # Fused one-pass: x and g each read from HBM exactly once.
        # ------------------------------------------------------------------
        bytes_accessed = int(2 * x3.size * isz_x + g3.size * isz_g
                             + w_cat.size * isz_w + b_cat.size * 4)
        flops = int(2 * B * F_x * HWx + B * F_g * HWg
                    + 2 * B * (F_x + F_g) * F_x)
        out3 = pl.pallas_call(
            _cca_fused_kernel,
            out_shape=jax.ShapeDtypeStruct((B, F_x, HWx), x.dtype),
            grid_spec=pltpu.PrefetchScalarGridSpec(
                num_scalar_prefetch=0,
                grid=(B // bt,),
                in_specs=[
                    pl.BlockSpec((bt, F_x, HWx), lambda b: (b, 0, 0)),     # x
                    pl.BlockSpec((bt, F_g, HWg), lambda b: (b, 0, 0)),     # g
                    _bspec((F_x + F_g, F_x), lambda b: (0, 0),
                           single_buffered=True),                          # [Wx^T;Wg^T]
                    _bspec((1, F_x), lambda b: (0, 0),
                           single_buffered=True),                          # bx + bg
                ],
                out_specs=pl.BlockSpec((bt, F_x, HWx), lambda b: (b, 0, 0)),
            ),
            compiler_params=pltpu.CompilerParams(
                dimension_semantics=("parallel",),
                vmem_limit_bytes=vmem_limit),
            cost_estimate=pl.CostEstimate(
                flops=flops, transcendentals=int(B * F_x),
                bytes_accessed=bytes_accessed),
        )(x3, g3, w_cat, b_cat)
    else:
        # ------------------------------------------------------------------
        # Two-pass fallback for feature maps that don't fit in VMEM.
        # Pass 1: jitted pooling + fused linear + sigmoid ([B, F]-sized).
        # Pass 2: 2-D tiled elementwise scale * ReLU at HBM roofline.
        # ------------------------------------------------------------------
        scale = _cca_pass1(x3, g3, w_cat, b_cat)                 # f32 [B, F_x]
        rows = B * F_x
        x2 = x3.reshape(rows, HWx)
        s2 = scale.reshape(rows, 1)
        tr, thw = _pick_2d_tiles(rows, HWx, isz_x, fused_budget)
        out2 = pl.pallas_call(
            _scale_relu_kernel,
            out_shape=jax.ShapeDtypeStruct((rows, HWx), x.dtype),
            grid_spec=pltpu.PrefetchScalarGridSpec(
                num_scalar_prefetch=0,
                grid=(pl.cdiv(rows, tr), pl.cdiv(HWx, thw)),
                in_specs=[
                    pl.BlockSpec((tr, thw), lambda r, t: (r, t)),          # x
                    pl.BlockSpec((tr, 1), lambda r, t: (r, 0)),            # scale
                ],
                out_specs=pl.BlockSpec((tr, thw), lambda r, t: (r, t)),
            ),
            compiler_params=pltpu.CompilerParams(
                dimension_semantics=("parallel", "parallel"),
                vmem_limit_bytes=vmem_limit),
            cost_estimate=pl.CostEstimate(
                flops=int(2 * rows * HWx), transcendentals=0,
                bytes_accessed=int(2 * rows * HWx * isz_x + rows * 4)),
        )(x2, s2)
        out3 = out2.reshape(B, F_x, HWx)

    return out3.reshape(B, F_x, Hx, Wx)


def cca_reference(g, x, wx, bx, wg, bg):
    """Pure-JAX reference mirroring the PyTorch module."""
    pooled_x = jnp.mean(x, axis=(2, 3))                          # [B, F_x]
    pooled_g = jnp.mean(g, axis=(2, 3))                          # [B, F_g]
    att_x = pooled_x @ wx.T + bx
    att_g = pooled_g @ wg.T + bg
    scale = jax.nn.sigmoid((att_x + att_g) / 2.0)
    return jnp.maximum(x * scale[:, :, None, None], 0.0)


if __name__ == "__main__":
    # Small shapes consistent with the module: g has F_g channels, x has F_x.
    B, F_g, F_x = 2, 8, 4
    Hx = Wx = 16
    Hg = Wg = 16

    key = jax.random.PRNGKey(0)
    kx, kg, kwx, kbx, kwg, kbg = jax.random.split(key, 6)

    x = jax.random.normal(kx, (B, F_x, Hx, Wx), dtype=jnp.float32)
    g = jax.random.normal(kg, (B, F_g, Hg, Wg), dtype=jnp.float32)

    # Deterministic Linear parameter init (uniform +-1/sqrt(fan_in), like PyTorch).
    bound_x = 1.0 / np.sqrt(F_x)
    bound_g = 1.0 / np.sqrt(F_g)
    wx = jax.random.uniform(kwx, (F_x, F_x), jnp.float32, -bound_x, bound_x)
    bx = jax.random.uniform(kbx, (F_x,), jnp.float32, -bound_x, bound_x)
    wg = jax.random.uniform(kwg, (F_x, F_g), jnp.float32, -bound_g, bound_g)
    bg = jax.random.uniform(kbg, (F_x,), jnp.float32, -bound_g, bound_g)

    ref = cca_reference(g, x, wx, bx, wg, bg)

    # Fused one-pass path (default for shapes that fit in VMEM).
    out = jax.block_until_ready(cca_forward(g, x, wx, bx, wg, bg))
    np.testing.assert_allclose(np.asarray(out), np.asarray(ref),
                               rtol=1e-5, atol=1e-5)

    # Also exercise the tiled two-pass fallback path.
    out2 = jax.block_until_ready(
        cca_forward(g, x, wx, bx, wg, bg, force_two_pass=True))
    np.testing.assert_allclose(np.asarray(out2), np.asarray(ref),
                               rtol=1e-5, atol=1e-5)

    print("KERNEL_OK")
</pallas_src>

<mosaic_0001>
module attributes {stable_mosaic.version = 11 : i64} {
  func.func @_cca_fused_kernel(%arg0: i32, %arg1: memref<1x4x256xf32, #tpu.memory_space<vmem>>, %arg2: memref<1x8x256xf32, #tpu.memory_space<vmem>>, %arg3: memref<12x4xf32, #tpu.memory_space<vmem>>, %arg4: memref<1x4xf32, #tpu.memory_space<vmem>>, %arg5: memref<1x4x256xf32, #tpu.memory_space<vmem>>) attributes {dimension_semantics = [#tpu.dimension_semantics<parallel>], iteration_bounds = array<i64: 2>, scalar_prefetch = 0 : i64, scratch_operands = 0 : i64, tpu.core_type = #tpu.core_type<tc>, window_params = [{transform_indices = @transform_0, window_bounds = array<i64: 1, 4, 256>}, {transform_indices = @transform_1, window_bounds = array<i64: 1, 8, 256>}, {pipeline_mode = #tpu.pipeline_mode<synchronous>, transform_indices = @transform_2, window_bounds = array<i64: 12, 4>}, {pipeline_mode = #tpu.pipeline_mode<synchronous>, transform_indices = @transform_3, window_bounds = array<i64: 1, 4>}, {transform_indices = @transform_4, window_bounds = array<i64: 1, 4, 256>}]} {
    %c0 = arith.constant 0 : index
    %c0_0 = arith.constant 0 : index
    %c0_1 = arith.constant 0 : index
    %0 = vector.load %arg1[%c0, %c0_0, %c0_1] : memref<1x4x256xf32, #tpu.memory_space<vmem>>, vector<1x4x256xf32>
    %cst = arith.constant dense<0.000000e+00> : vector<1x4xf32>
    %1 = vector.multi_reduction <add>, %0, %cst [2] : vector<1x4x256xf32> to vector<1x4xf32>
    %cst_2 = arith.constant 2.560000e+02 : f32
    %2 = vector.broadcast %cst_2 : f32 to vector<1x4xf32>
    %3 = arith.divf %1, %2 : vector<1x4xf32>
    %c0_3 = arith.constant 0 : index
    %c0_4 = arith.constant 0 : index
    %c0_5 = arith.constant 0 : index
    %4 = vector.load %arg2[%c0_3, %c0_4, %c0_5] : memref<1x8x256xf32, #tpu.memory_space<vmem>>, vector<1x8x256xf32>
    %cst_6 = arith.constant dense<0.000000e+00> : vector<1x8xf32>
    %5 = vector.multi_reduction <add>, %4, %cst_6 [2] : vector<1x8x256xf32> to vector<1x8xf32>
    %cst_7 = arith.constant 2.560000e+02 : f32
    %6 = vector.broadcast %cst_7 : f32 to vector<1x8xf32>
    %7 = arith.divf %5, %6 : vector<1x8xf32>
    %8 = tpu.concatenate %3, %7 in 1 : vector<1x4xf32>, vector<1x8xf32> -> vector<1x12xf32>
    %c0_8 = arith.constant 0 : index
    %c0_9 = arith.constant 0 : index
    %9 = vector.load %arg3[%c0_8, %c0_9] : memref<12x4xf32, #tpu.memory_space<vmem>>, vector<12x4xf32>
    %cst_10 = arith.constant dense<0.000000e+00> : vector<1x4xf32>
    %10 = tpu.matmul %8, %9, %cst_10 {dimension_numbers = #tpu.dot_dimension_numbers<[1], [0], [0], [1], [0, 0, 1, 1], [], []>} : vector<1x12xf32>, vector<12x4xf32>, vector<1x4xf32> -> vector<1x4xf32>
    %c0_11 = arith.constant 0 : index
    %c0_12 = arith.constant 0 : index
    %11 = vector.load %arg4[%c0_11, %c0_12] : memref<1x4xf32, #tpu.memory_space<vmem>>, vector<1x4xf32>
    %12 = arith.addf %10, %11 : vector<1x4xf32>
    %cst_13 = arith.constant 5.000000e-01 : f32
    %13 = vector.broadcast %cst_13 : f32 to vector<1x4xf32>
    %14 = arith.mulf %12, %13 : vector<1x4xf32>
    %15 = arith.negf %14 : vector<1x4xf32>
    %16 = math.exp %15 : vector<1x4xf32>
    %cst_14 = arith.constant 1.000000e+00 : f32
    %17 = vector.broadcast %cst_14 : f32 to vector<1x4xf32>
    %18 = arith.addf %17, %16 : vector<1x4xf32>
    %19 = arith.divf %17, %18 : vector<1x4xf32>
    %20 = vector.shape_cast %19 : vector<1x4xf32> to vector<1x4x1xf32>
    %21 = vector.broadcast %20 : vector<1x4x1xf32> to vector<1x4x256xf32>
    %22 = arith.mulf %0, %21 : vector<1x4x256xf32>
    %cst_15 = arith.constant 0.000000e+00 : f32
    %23 = vector.broadcast %cst_15 : f32 to vector<1x4x256xf32>
    %24 = arith.maximumf %22, %23 : vector<1x4x256xf32>
    %c0_16 = arith.constant 0 : index
    %c0_17 = arith.constant 0 : index
    %c0_18 = arith.constant 0 : index
    %25 = vector.load %arg5[%c0_16, %c0_17, %c0_18] : memref<1x4x256xf32, #tpu.memory_space<vmem>>, vector<1x4x256xf32>
    tpu.vector_store %arg5[%c0_16, %c0_17, %c0_18], %24 {strides = array<i32>} : memref<1x4x256xf32, #tpu.memory_space<vmem>>, vector<1x4x256xf32>,
    return
  }
  func.func @transform_0(%arg0: i32) -> (i32, i32, i32) {
    %c0_i32 = arith.constant 0 : i32
    %c0_i32_0 = arith.constant 0 : i32
    %c0_i32_1 = arith.constant 0 : i32
    return %arg0, %c0_i32, %c0_i32_0 : i32, i32, i32
  }
  func.func @transform_1(%arg0: i32) -> (i32, i32, i32) {
    %c0_i32 = arith.constant 0 : i32
    %c0_i32_0 = arith.constant 0 : i32
    %c0_i32_1 = arith.constant 0 : i32
    return %arg0, %c0_i32, %c0_i32_0 : i32, i32, i32
  }
  func.func @transform_2(%arg0: i32) -> (i32, i32) {
    %c0_i32 = arith.constant 0 : i32
    %c0_i32_0 = arith.constant 0 : i32
    %c0_i32_1 = arith.constant 0 : i32
    return %c0_i32, %c0_i32_0 : i32, i32
  }
  func.func @transform_3(%arg0: i32) -> (i32, i32) {
    %c0_i32 = arith.constant 0 : i32
    %c0_i32_0 = arith.constant 0 : i32
    %c0_i32_1 = arith.constant 0 : i32
    return %c0_i32, %c0_i32_0 : i32, i32
  }
  func.func @transform_4(%arg0: i32) -> (i32, i32, i32) {
    %c0_i32 = arith.constant 0 : i32
    %c0_i32_0 = arith.constant 0 : i32
    %c0_i32_1 = arith.constant 0 : i32
    return %arg0, %c0_i32, %c0_i32_0 : i32, i32, i32
  }
}

</mosaic_0001>

<bundles_post_ra>
// kernel: tpu_custom_call.1
= control target key start
LH: loop header
LB: loop body
LE: loop exit
PB: predicated region body
PF: predicated region fallthrough
CT: control target
= control target key end

     0   :  { %9 = vsyncpa [#allocation3], 0  ;;  %s873_s0 = inlined_call_operand.vmem [shape: f32[2,4,256], index: 0, kind: input, shape index: {}]   ;;  %s874_s1 = inlined_call_operand.hbm [shape: f32[2,8,256], index: 1, kind: input, shape index: {}]   ;;  %s875_s2 = inlined_call_operand.vmem [shape: f32[12,4], index: 2, kind: input, shape index: {}]   ;;  %s876_s3 = inlined_call_operand.vmem [shape: f32[1,4], index: 3, kind: input, shape index: {}]   ;;  %s877_s4 = inlined_call_operand.hbm [shape: f32[2,4,256], index: 4, kind: output, shape index: {}]  }
   0x1   :  { %11 = vsyncpa [#allocation3 + $0x1], 0 }
   0x2   :  { %12 = vsyncpa [#allocation4], 0 }
   0x3   :  { %14 = vsyncpa [#allocation4 + $0x1], 0  ;;  %s694_s15 = smov 0   ;;  %s696_s16 = smov 0  }
   0x4   :  { %s698_s17 = smov 0   ;;  %s700_s18 = smov 0  }
   0x5 LB: > { %s715_s19 = sadd.s32 4294967295, %s660_s18   ;;  %s472_s20 = sadd.s32 4294967294, %s660_s18   ;;  %s660_s18 = sphi %s700_s18, %s892_s18   ;;  %s656_s17 = sphi %s698_s17, %s891_s17   ;;  %s652_s16 = sphi %s696_s16, %s890_s16   ;;  %s648_s15 = sphi %s694_s15, %s889_s15  }
   0x6   : > { %s719_s21 = sadd.s32 1, %s660_s18   ;;  %s53_s22 = sadd.s32 1, %s656_s17 }
   0x7   : > { %s50_s23 = ssub.s32 %s660_s18, %s719_s21  ;;  %p60_p0 = scmp.ne.s32.totalorder %s656_s17, %s652_s16 }
   0x8   : > { %p51_p1 = scmp.eq.s32.totalorder %s50_s23, 0  ;;  %p61_p2 = scmp.eq.s32.totalorder %s660_s18, 0 }
   0x9   : > { %p66_p3 = scmp.ne.s32.totalorder %s652_s16, %s648_s15  ;;  %p67_p4 = scmp.eq.s32.totalorder %s715_s19, 0 }
   0xa   : > { %s731_s24 = scalar_select %p51_p1, %s656_s17, %s53_s22  }
   0xb   : > { %p733_p5 = por %p61_p2, %p60_p0  ;;  %p737_p6 = por %p67_p4, %p66_p3 }
   0xc   : > { %p132_p7 = scmp.eq.s32.totalorder %s715_s19, 1  ;;  %p138_p8 = scmp.eq.s32.totalorder %s472_s20, 1 }
   0xd   : > { %p520_p10 = scmp.lt.s32.totalorder %s660_s18, 2  ;;  %s172_s29 = sand.u32 1, %s656_s17  }
   0xe   : > { %p744_p11 = por %p132_p7, %p60_p0  ;;  %p748_p12 = por %p138_p8, %p66_p3 }
   0xf   : > { %s491_s30 = sshll.u32 %s660_s18, 8  ;;  %s475_s5 = sshll.u32 %s172_s29, 4 }
  0x10   : > { %s881_s27 = scalar_select %p744_p11, 1, 0 }
  0x11   : > { %s882_s28 = scalar_select %p748_p12, 1, 0 }
  0x12   : > { %s757_s8 = scalar_lea.hbm %s874_s1, %s491_s30  ;;  %s176_s9 = scalar_lea.vmem [#allocation2], %s475_s5 }
  0x13   : > { %s184_s10 = sshll.u32 %s176_s9, 4  ;;  %p761_p13 = pnand %p520_p10, %p733_p5  ;;  %s765_s10 = int_to_ptr.vmem [resolvable:$true] %s184_s10 }
  0x14   : > { %s173_s12 = scalar_lea.sflag [#allocation3], %s172_s29  ;;  %s564_s13 = scalar_lea.hbm %s757_s8, 256 }
  0x15   : > { %p565_p2 = scmp.ne.s32.totalorder %s757_s8, %s564_s13  ;;  %p566_p3 = pneg %p761_p13 }
  0x16   : > { %s569_s22 = scalar_lea.hbm %s874_s1, 512  ;;  %p570_p5 = scmp.lt.u32.totalorder %s757_s8, %s874_s1 }
  0x17   : > { %p567_p4 = pnand %p566_p3, %p565_p2  ;;  %p571_p8 = scmp.lt.u32.totalorder %s569_s22, %s564_s13 }
  0x18   : > { %p573_p9 = scmp.lt.u32.totalorder %s564_s13, %s757_s8 }
  0x19   : > { %p568_p7 = pneg %p567_p4  ;;  %p572_p10 = por %p571_p8, %p570_p5 }
  0x1b   : > { %p574_p0 = por %p573_p9, %p572_p10 }
  0x1d   : > { %p575_p1 = pnand %p574_p0, %p568_p7 }
  0x1f   : > { %578 = shalt.err (!%p575_p1)
}
  0x20   : > { %s579_s29 = scalar_lea.vmem %s765_s10, 256  ;;  %s662_s30 = smov [#allocation2]  }
  0x21   : > { %p580_p2 = scmp.ne.s32.totalorder %s765_s10, %s579_s29  ;;  %s584_s5 = sshll.u32 %s662_s30, 4  ;;  %s585_s5 = int_to_ptr.vmem [resolvable:$false] %s584_s5 }
  0x22   : > { %s586_s6 = scalar_lea.vmem %s585_s5, 512  ;;  %p587_p11 = scmp.lt.s32.totalorder %s765_s10, %s585_s5 }
  0x23   : > { %p582_p4 = pnand %p580_p2, %p566_p3  ;;  %p588_p5 = scmp.lt.s32.totalorder %s586_s6, %s579_s29 }
  0x25   : > { %p583_p12 = pneg %p582_p4  ;;  %p589_p8 = por %p588_p5, %p587_p11 }
  0x27   : > { %p590_p9 = pnand %p589_p8, %p583_p12 }
  0x29   : > { %593 = shalt.err (!%p590_p9)
}
  0x2a   : > { %515 = dma.hbm_to_vmem [thread:$0]  (!%p761_p13), %s757_s8, 256, %s765_s10, %s173_s12  }
  0x2b   : > { %p884_p0 = scmp.lt.s32.totalorder %s660_s18, 3  ;;  %p885_p1 = scmp.ge.s32.totalorder %s660_s18, 1 }
  0x2d   : > { %p190_p3 = pnand %p885_p1, %p884_p0 }
  0x2e   : > { %s799_s7 = sand.u32 (!%p190_p3), 1, %s652_s16  }
  0x2f   : > { %193 = sbr.rel (%p190_p3) target bundleno = 597 (0x255), region = 36  ;;  %s479_s9 = sshll.u32 (!%p190_p3), %s799_s7, 4 }
  0x30   : > { %s196_s13 = scalar_lea.sflag (!%p190_p3), [#allocation3], %s799_s7  ;;  %s199_s14 = scalar_lea.vmem (!%p190_p3), [#allocation2], %s479_s9 }
  0x36   : > { %639 = dma.done.wait (%p737_p6), %s196_s13, 256  }
  0x37   : > { %641 = vsyncadd (%p737_p6), %s196_s13, 4294967040  ;;  %p229_p11 = scmp.lt.s32.totalorder %s715_s19, 1  ;;  %vm238_vm0 = vcmask 1043456   ;;  %v246_v4 = vld [vmem:[%s199_s14] sm:$0xff]  ;;  %v247_v5 = vld [vmem:[%s199_s14 + $0x8] sm:$0xff]  ;;  %v663_v11 = vmov 0.0|0.0   ;;  %v253_v13 = vlaneseq }
  0x38   : > { %v248_v7 = vadd.f32 %v247_v5, %v246_v4  ;;  %v269_v8 = vld [vmem:[%s875_s2] sm:$0xff]  ;;  %v270_v9 = vld [vmem:[%s875_s2 + $0x8] sm:$0xf]  ;;  %504 = vmatprep.subr.bf16.mxu0 %v663_v11  ;;  %vm664_vm1 = vmmov 1   ;;  %vm665_vm3 = vmmov 0   ;;  %v666_v12 = vmov 0.0  }
  0x39   : > { %s230_s8 = scalar_select %p229_p11, %s715_s19, 1  ;;  %v505_v10 = vpack.c.bf16 %v270_v9, %v269_v8  ;;  %vm506_vm2 = vmpackc.low %vm238_vm0, %vm664_vm1  ;;  %501 = vmatprep.mubr.msk.f32.mxu0 %vm665_vm3, %v666_v12  ;;  %v254_v14 = vand.u32 127, %v253_v13  ;;  %v256_v15 = vshrl.u32 %v253_v13, 7  ;;  %vm267_vm4 = vcmask 31744   ;;  %v271_v26 = vld [vmem:[%s876_s3] sm:$0x1] }
  0x3a   : > { %vm272_vm5 = vcmask 97280   ;;  %v667_v37 = vmov 839922192   ;;  %s480_s5 = sshll.u32 %s799_s7, 3  ;;  %s493_s6 = sshll.u32 %s715_s19, 7 }
  0x3b   : > { %s492_s10 = sshll.u32 %s230_s8, 3  ;;  %507 = vmatpush3.bf16.msk.msra.mxu0 %vm506_vm2, %v505_v10  ;;  %v261_v16 = vadd.s32 4294967292, %v254_v14  ;;  %v257_v18 = vsub.s32 %v254_v14, %v256_v15  ;;  %v358_v34 = vsub.s32 0, %v256_v15  ;;  %v365_v38 = vunpack.c.l.s4 %v667_v37  ;;  %s228_s9 = scalar_lea.vmem [#allocation5], %s480_s5 }
  0x3c   : > { %s233_s20 = scalar_lea.vmem %s873_s0, %s492_s10  ;;  %s390_s13 = sshll.u32 %s228_s9, 4  ;;  %s831_s13 = int_to_ptr.vmem [resolvable:$true] %s390_s13 }
  0x3d   : > { %v234_v0 = vld [vmem:[%s233_s20] sm:$0xff]  ;;  %v264_v20 = vsub.s32 %v261_v16, %v256_v15  ;;  %v366_v39 = vunpack.c.0.s8 %v365_v38  ;;  %s829_s10 = scalar_lea.hbm %s877_s4, %s493_s6  ;;  %s376_s11 = scalar_lea.sflag [#allocation4], %s799_s7 }
  0x3e   : > { %v236_v1 = vcombine.high %v234_v0, %v234_v0  ;;  %v239_v2 = vsel %vm238_vm0, %v234_v0, 0.0  ;;  %s594_s12 = scalar_lea.vmem %s831_s13, 128  ;;  %p886_p12 = scmp.ne.s32.totalorder %s881_s27, 0 }
  0x3f   : > { %v369_v40 = vsub.s32 %v366_v39, %v256_v15  ;;  %p595_p6 = scmp.ne.s32.totalorder %s831_s13, %s594_s12  ;;  %s668_s19 = smov [#allocation5]  }
  0x40   : > { %v240_v3 = vsel %vm238_vm0, %v236_v1, 0.0  ;;  %s598_s20 = sshll.u32 %s668_s19, 4  ;;  %s599_s20 = int_to_ptr.vmem [resolvable:$false] %s598_s20 }
  0x41   : > { %v241_v6 = vadd.f32 %v240_v3, %v239_v2  ;;  %p596_p13 = pnand %p595_p6, %p886_p12  ;;  %s600_s26 = scalar_lea.vmem %s599_s20, 256 }
  0x42   : > { %p601_p10 = scmp.lt.s32.totalorder %s831_s13, %s599_s20  ;;  %p602_p2 = scmp.lt.s32.totalorder %s600_s26, %s594_s12 }
  0x43   : > { %242 = vadd.xlane.f32.xlu0 %v241_v6  ;;  %p597_p7 = pneg %p596_p13 }
  0x44   : > { %p603_p4 = por %p602_p2, %p601_p10 }
  0x46   : > { %p604_p5 = pnand %p603_p4, %p597_p7 }
  0x47   : > { %249 = vadd.xlane.f32.xlu0 %v248_v7 }
  0xd0   : > { %v243_v17 = vpop.xlane.xlu0 %242 }
  0xd1   : > { %v245_v19 = vmul.f32 0.00390625, %v243_v17 }
  0xd3   : > { %v258_v23 = vrot.slane %v245_v19, %v257_v18 }
  0xd4   : > { %v250_v21 = vpop.xlane.xlu0 %249 }
  0xd5   : > { %v251_v22 = vmul.f32 0.00390625, %v250_v21 }
  0xd7   : > { %v265_v24 = vrot.slane %v251_v22, %v264_v20 }
  0xd9   : > { %v268_v25 = vsel %vm267_vm4, %v258_v23, %v265_v24 }
  0xda   : > { %502 = vmatmul.mubr.msk.f32.vlgmr.msra.gmra.mrb[0].mxu0 %vm272_vm5, %v268_v25 }
 0x1ad   : > { %v345_v27 = vpop.f32.mrb[0].mxu0 }
 0x1ae   : > { %v346_v28 = vadd.f32 %v345_v27, %v271_v26  ;;  %v503_v29 = vpop.f32.mrb[1].mxu0 }
 0x1b0   : > { %v485_v30 = vmul.f32 -0.5, %v346_v28 }
 0x1b2   : > { %v351_v31 = vmul.f32 1.442695, %v485_v30 }
 0x1b4   : > { %560 = vpow2.f32 %v351_v31 }
 0x1be   : > { %v561_v32 = vpop.eup %560 }
 0x1bf   : > { %v353_v33 = vadd.f32 1.0, %v561_v32 }
 0x1c1   : > { %562 = vrcp.f32 %v353_v33 }
 0x1cb   : > { %v563_v35 = vpop.eup %562 }
 0x1cc   : > { %v359_v36 = vrot.slane %v563_v35, %v358_v34 }
 0x1ce   : > { %361 = vbcast.lane.b32.xlu1 %v359_v36, 256 }
 0x240   : > { %v362_v41 = vpop.permute.xlu1 %361 }
 0x241   : > { %v370_v42 = vrot.slane %v362_v41, %v369_v40 }
 0x243   : > { %v372_v43 = vmul.f32 %v370_v42, %v234_v0 }
 0x245   : > { %v373_v44 = vmax.f32 %v372_v43, 0.0 }
 0x247   : > { %374 = vst [vmem:[%s228_s9] sm:$0xff] %v373_v44 }
 0x248   : > { %607 = shalt.err (!%p604_p5)
}
 0x249   : > { %s608_s7 = scalar_lea.hbm %s829_s10, 128  ;;  %s612_s25 = scalar_lea.hbm %s877_s4, 256 }
 0x24a   : > { %p609_p8 = scmp.ne.s32.totalorder %s829_s10, %s608_s7  ;;  %p613_p1 = scmp.lt.u32.totalorder %s829_s10, %s877_s4 }
 0x24b   : > { %p614_p3 = scmp.lt.u32.totalorder %s612_s25, %s608_s7  ;;  %p616_p6 = scmp.lt.u32.totalorder %s608_s7, %s829_s10 }
 0x24c   : > { %p610_p9 = pnand %p609_p8, %p886_p12 }
 0x24d   : > { %p615_p11 = por %p614_p3, %p613_p1 }
 0x24e   : > { %p611_p0 = pneg %p610_p9 }
 0x24f   : > { %p617_p13 = por %p616_p6, %p615_p11 }
 0x251   : > { %p618_p7 = pnand %p617_p13, %p611_p0 }
 0x253   : > { %621 = shalt.err (!%p618_p7)
}
 0x254   : > { %510 = dma.vmem_to_hbm [thread:$0]  (%p886_p12), %s831_s13, 128, %s829_s10, %s376_s11  }
 0x255 PF: > { %s402_s5 = sand.u32 1, %s648_s15   ;;  %p887_p10 = scmp.ne.s32.totalorder %s882_s28, 0 }
 0x256   : > { %p888_p2 = scmp.ge.s32.totalorder %s660_s18, 2  ;;  %s403_s6 = scalar_lea.sflag [#allocation4], %s402_s5 }
 0x258   : > { %p517_p4 = pnand %p888_p2, %p887_p10 }
 0x25a   : > { %643 = dma.done.wait (!%p517_p4), %s403_s6, 128  }
 0x25b   : > { %645 = vsyncadd (!%p517_p4), %s403_s6, 4294967168  ;;  %p17_p5 = scmp.ge.s32.totalorder %s719_s21, 4   ;;  %s889_s15 = smov %s652_s16 }
 0x25c   : > { %s890_s16 = smov %s656_s17  ;;  %s891_s17 = smov %s731_s24 }
 0x25d   : > { %s892_s18 = smov %s719_s21  ;;  %19 = sbr.rel (!%p17_p5) target bundleno = 5 (0x5), region = 84 }
 0x264   :  { %408 = vsyncpa [#allocation3], 1 }
 0x265   :  { %410 = vsyncpa [#allocation3 + $0x1], 1 }
 0x266   :  { %411 = vsyncpa [#allocation4], 1 }
 0x267   :  { %413 = vsyncpa [#allocation4 + $0x1], 1 }

</bundles_post_ra>
